<compile_context>
chip_gen: v5e
topology: v5e:2x2
jax: 0.10.0
libtpu: 0.0.40
codegen_flags: <defaults>
</compile_context>

<pallas_src>
import functools

import jax
import jax.numpy as jnp
from jax.experimental import pallas as pl
from jax.experimental.pallas import tpu as pltpu


def _round_up(a, m):
    return (a + m - 1) // m * m


def _classifier_kernel(x_ref, w_ref, c_ref, o_ref, *, normalize: bool, eps: float):
    # x_ref: (TM, D)  input rows, native dtype (pipelined over the grid)
    # w_ref: (1, D)   f32 folded weight (gamma*w if normalize else w), resident
    # c_ref: (1,)     f32 folded bias (dot(beta, w) + b if normalize else b), SMEM
    # o_ref: (TM, 1)  logits for this tile
    x = x_ref[...]
    w = w_ref[...]                                        # (1, D) f32

    if normalize:
        # LayerNorm (biased variance, like torch.nn.LayerNorm) folded with the
        # fc weight: logit = rsqrt(var+eps) * sum((x-mean) * gamma*w) + (beta.w + b).
        xf = x.astype(jnp.float32)
        mean = jnp.mean(xf, axis=-1, keepdims=True)       # (TM, 1)
        xc = xf - mean                                    # (TM, D)
        var = jnp.mean(xc * xc, axis=-1, keepdims=True)   # (TM, 1)
        s = jnp.sum(xc * w, axis=-1, keepdims=True)       # (TM, 1)
        logits = s * jax.lax.rsqrt(var + eps) + c_ref[0]
        # TODO(synk): optional single-pass (sum, sum(x^2), sum(x*gw)) variant and
        # lane-packing for D < 128 are not implemented (numerical-robustness /
        # layout trade-offs); the centered two-pass form is kept.
    else:
        prod = x.astype(jnp.float32) * w                  # (TM, D) f32
        logits = jnp.sum(prod, axis=-1, keepdims=True) + c_ref[0]

    o_ref[...] = logits.astype(o_ref.dtype)


def binary_classifier_forward(x, gamma, beta, w, b, *, normalize=False, eps=1e-5,
                              block_rows=None):
    """Forward pass of BinaryClassifier. x: (..., D) -> logits (..., 1)."""
    orig_shape = x.shape
    D = orig_shape[-1]
    x2 = x.reshape(-1, D)
    M = x2.shape[0]
    itemsize = x2.dtype.itemsize
    out_itemsize = itemsize

    # ---- Row-tile sizing from a VMEM budget that counts the f32 temporaries. ----
    # Per element of a tile we pay ~2*itemsize for the double-buffered x stream plus
    # ~8 B (normalize) / ~4 B (plain) of f32 working set inside the kernel.
    f32_working = 8 if normalize else 4
    bytes_per_elem = 2 * itemsize + f32_working
    vmem_budget = 40 * 1024 * 1024          # <= vmem_limit_bytes below, fits v7x 64 MiB
    tm = max(8, (vmem_budget // (D * bytes_per_elem)) // 8 * 8)
    tm = min(tm, _round_up(M, 8))
    if block_rows is not None:
        tm = min(tm, max(8, _round_up(block_rows, 8)))
    num_tiles = pl.cdiv(M, tm)              # ragged last tile handled by Pallas

    # ---- Algebraic weight folding (O(D) on the XLA side). ----
    w_flat = w.reshape(-1).astype(jnp.float32)            # (D,)
    b_scalar = b.reshape(()).astype(jnp.float32)
    if normalize:
        w_fold = (gamma.reshape(-1).astype(jnp.float32) * w_flat).reshape(1, D)
        c_fold = (jnp.dot(beta.reshape(-1).astype(jnp.float32), w_flat)
                  + b_scalar).reshape(1)
    else:
        w_fold = w_flat.reshape(1, D)
        c_fold = b_scalar.reshape(1)

    kernel = functools.partial(_classifier_kernel, normalize=normalize, eps=eps)

    cost = pl.CostEstimate(
        flops=(5 if normalize else 2) * M * D,
        transcendentals=M if normalize else 0,
        bytes_accessed=M * D * itemsize + D * 4 + M * out_itemsize,
    )

    out = pl.pallas_call(
        kernel,
        out_shape=jax.ShapeDtypeStruct((M, 1), x.dtype),
        grid=(num_tiles,),
        in_specs=[
            pl.BlockSpec((tm, D), lambda i: (i, 0)),             # x rows (pipelined)
            pl.BlockSpec((1, D), lambda i: (0, 0)),              # folded weight (resident)
            pl.BlockSpec(memory_space=pltpu.MemorySpace.SMEM),   # folded bias scalar
        ],
        out_specs=pl.BlockSpec((tm, 1), lambda i: (i, 0)),
        compiler_params=pltpu.CompilerParams(
            dimension_semantics=("parallel",),
            vmem_limit_bytes=48 * 1024 * 1024),
        cost_estimate=cost,
    )(x2, w_fold, c_fold)

    return out.reshape(orig_shape[:-1] + (1,))


def sigmoid_activation(logits):
    # BinaryClassifier.activation (nn.Sigmoid) — elementwise glue, not part of forward().
    return jax.nn.sigmoid(logits)


def _reference(x, gamma, beta, w, b, *, normalize, eps=1e-5):
    x = x.astype(jnp.float32)
    if normalize:
        mean = jnp.mean(x, axis=-1, keepdims=True)
        var = jnp.mean((x - mean) ** 2, axis=-1, keepdims=True)
        x = (x - mean) * jax.lax.rsqrt(var + eps) * gamma + beta
    return x @ w.reshape(-1, 1) + b


if __name__ == "__main__":
    key = jax.random.PRNGKey(0)
    B, S, D = 2, 8, 32   # batch=2, seq=8, embed_dim=32

    kx, kw = jax.random.split(key)
    x = jax.random.normal(kx, (B, S, D), dtype=jnp.float32)

    # Deterministic parameter init, mirroring the module's __init__:
    gamma = jnp.ones((D,), jnp.float32)                          # LayerNorm weight
    beta = jnp.zeros((D,), jnp.float32)                          # LayerNorm bias
    w = 0.01 * jax.random.normal(kw, (1, D), dtype=jnp.float32)  # fc.weight ~ N(0, 0.01)
    b = jnp.zeros((1,), jnp.float32)                             # fc.bias = 0

    # normalize=False (module default) and normalize=True paths.
    out_plain = binary_classifier_forward(x, gamma, beta, w, b, normalize=False)
    out_norm = binary_classifier_forward(x, gamma, beta, w, b, normalize=True)
    jax.block_until_ready((out_plain, out_norm))

    ref_plain = _reference(x, gamma, beta, w, b, normalize=False)
    ref_norm = _reference(x, gamma, beta, w, b, normalize=True)

    assert out_plain.shape == (B, S, 1)
    assert jnp.allclose(out_plain, ref_plain, atol=1e-5, rtol=1e-5)
    assert jnp.allclose(out_norm, ref_norm, atol=1e-5, rtol=1e-5)

    # Multi-tile pipeline (2 grid steps, resident folded weight, pipelined x stream).
    out_tiled = binary_classifier_forward(x, gamma, beta, w, b,
                                          normalize=True, block_rows=8)
    assert jnp.allclose(out_tiled, ref_norm, atol=1e-5, rtol=1e-5)

    # Ragged-row paths (no jnp.pad: Pallas boundary block handles the partial tile).
    x_odd = jax.random.normal(key, (2, 5, D), dtype=jnp.float32)   # M = 10
    ref_odd = _reference(x_odd, gamma, beta, w, b, normalize=True)
    out_odd = binary_classifier_forward(x_odd, gamma, beta, w, b, normalize=True)
    assert out_odd.shape == (2, 5, 1)
    assert jnp.allclose(out_odd, ref_odd, atol=1e-5, rtol=1e-5)
    # Ragged last grid tile specifically (tm=8, M=10 -> 2 tiles, last one partial).
    out_odd_tiled = binary_classifier_forward(x_odd, gamma, beta, w, b,
                                              normalize=True, block_rows=8)
    assert jnp.allclose(out_odd_tiled, ref_odd, atol=1e-5, rtol=1e-5)

    # activation() method equivalent (not part of forward()):
    probs = sigmoid_activation(out_norm)
    jax.block_until_ready(probs)

    print("KERNEL_OK")
</pallas_src>

<mosaic_0001>
module attributes {stable_mosaic.version = 11 : i64} {
  func.func @_classifier_kernel(%arg0: i32, %arg1: memref<16x32xf32, #tpu.memory_space<vmem>>, %arg2: memref<1x32xf32, #tpu.memory_space<vmem>>, %arg3: memref<1xf32, #tpu.memory_space<smem>>, %arg4: memref<16x1xf32, #tpu.memory_space<vmem>>) attributes {dimension_semantics = [#tpu.dimension_semantics<parallel>], iteration_bounds = array<i64: 1>, scalar_prefetch = 0 : i64, scratch_operands = 0 : i64, tpu.core_type = #tpu.core_type<tc>, window_params = [{transform_indices = @transform_0, window_bounds = array<i64: 16, 32>}, {pipeline_mode = #tpu.pipeline_mode<synchronous>, transform_indices = @transform_1, window_bounds = array<i64: 1, 32>}, {transform_indices = @transform_2, window_bounds = array<i64: 1>}, {transform_indices = @transform_3, window_bounds = array<i64: 16, 1>}]} {
    %c0 = arith.constant 0 : index
    %c0_0 = arith.constant 0 : index
    %0 = vector.load %arg1[%c0, %c0_0] : memref<16x32xf32, #tpu.memory_space<vmem>>, vector<16x32xf32>
    %c0_1 = arith.constant 0 : index
    %c0_2 = arith.constant 0 : index
    %1 = vector.load %arg2[%c0_1, %c0_2] : memref<1x32xf32, #tpu.memory_space<vmem>>, vector<1x32xf32>
    %2 = vector.broadcast %1 : vector<1x32xf32> to vector<16x32xf32>
    %3 = arith.mulf %0, %2 : vector<16x32xf32>
    %cst = arith.constant dense<0.000000e+00> : vector<16xf32>
    %4 = vector.multi_reduction <add>, %3, %cst [1] : vector<16x32xf32> to vector<16xf32>
    %5 = vector.shape_cast %4 : vector<16xf32> to vector<16x1xf32>
    %c0_3 = arith.constant 0 : index
    %6 = memref.load %arg3[%c0_3] : memref<1xf32, #tpu.memory_space<smem>>
    %7 = vector.broadcast %6 : f32 to vector<16x1xf32>
    %8 = arith.addf %5, %7 : vector<16x1xf32>
    %c0_4 = arith.constant 0 : index
    %c0_5 = arith.constant 0 : index
    %9 = vector.load %arg4[%c0_4, %c0_5] : memref<16x1xf32, #tpu.memory_space<vmem>>, vector<16x1xf32>
    tpu.vector_store %arg4[%c0_4, %c0_5], %8 {strides = array<i32>} : memref<16x1xf32, #tpu.memory_space<vmem>>, vector<16x1xf32>,
    return
  }
  func.func @transform_0(%arg0: i32) -> (i32, i32) {
    %c0_i32 = arith.constant 0 : i32
    %c0_i32_0 = arith.constant 0 : i32
    return %arg0, %c0_i32 : i32, i32
  }
  func.func @transform_1(%arg0: i32) -> (i32, i32) {
    %c0_i32 = arith.constant 0 : i32
    %c0_i32_0 = arith.constant 0 : i32
    %c0_i32_1 = arith.constant 0 : i32
    return %c0_i32, %c0_i32_0 : i32, i32
  }
  func.func @transform_2(%arg0: i32) -> i32 {
    %c0_i32 = arith.constant 0 : i32
    %c0_i32_0 = arith.constant 0 : i32
    return %c0_i32 : i32
  }
  func.func @transform_3(%arg0: i32) -> (i32, i32) {
    %c0_i32 = arith.constant 0 : i32
    %c0_i32_0 = arith.constant 0 : i32
    return %arg0, %c0_i32 : i32, i32
  }
}

</mosaic_0001>

<bundles_post_ra>
// kernel: tpu_custom_call.1
= control target key start
LH: loop header
LB: loop body
LE: loop exit
PB: predicated region body
PF: predicated region fallthrough
CT: control target
= control target key end

     0   :  { %9 = vsyncpa [#allocation4], 0  ;;  %s88_s15 = smov [#allocation3]   ;;  %s89_s17 = smov 128   ;;  %s126_s0 = inlined_call_operand.hbm [shape: f32[16,32], index: 0, kind: input, shape index: {}]   ;;  %s127_s1 = inlined_call_operand.vmem [shape: f32[1,32], index: 1, kind: input, shape index: {}]   ;;  %s128_s2 = inlined_call_operand.<no memory space> [shape: f32[1], index: 2, kind: input, shape index: {}]   ;;  %s129_s3 = inlined_call_operand.vmem [shape: f32[16,1], index: 3, kind: output, shape index: {}]  }
   0x1   :  { %s14_s14 = sshll.u32 %s126_s0, 4  ;;  %s16_s16 = sshll.u32 %s88_s15, 4  ;;  %s15_s14 = int_to_ptr.hbm [resolvable:$true] %s14_s14  ;;  %s17_s16 = int_to_ptr.vmem [resolvable:$true] %s16_s16 }
   0x2   :  { %s90_s18 = smov 8  }
   0x3   :  { %22 = dma.hbm_to_vmem [thread:$0]  %s15_s14, 256, %s17_s16, [#allocation4], %s89_s17, %s89_s17, %s90_s18  }
   0x4   :  { %86 = dma.done.wait [#allocation4], 256  }
   0x5   :  { %87 = vsyncadd [#allocation4], 4294967040  ;;  %v31_v0 = vld [vmem:[#allocation3] sm:$0xff]  ;;  %vm39_vm0 = vcmask 261120   ;;  %v32_v3 = vld [vmem:[#allocation3 + $0x8] sm:$0xff]  ;;  %v47_v7 = vstv %s128_s2  ;;  %vm50_vm1 = vcmask 7168  }
   0x6   :  { %v61_v1 = vld [vmem:[%s127_s1] ss:$0 sm:$0xff] }
   0x7   :  { %v37_v2 = vmul.f32 %v61_v1, %v31_v0  ;;  %v38_v5 = vmul.f32 %v61_v1, %v32_v3 }
   0x9   :  { %v40_v4 = vsel %vm39_vm0, %v37_v2, 0.0  ;;  %v43_v6 = vsel %vm39_vm0, %v38_v5, 0.0 }
   0xa   :  { %41 = vadd.xlane.f32.xlu0 %v40_v4 }
  0x12   :  { %44 = vadd.xlane.f32.xlu0 %v43_v6 }
  0x7d   :  { %v42_v8 = vpop.xlane.xlu0 %41 }
  0x7e   :  { %v48_v9 = vadd.f32 %v47_v7, %v42_v8 }
  0x80   :  { %51 = vst.msk [vmem:[%s129_s3] sm:$0xff] %vm50_vm1, %v48_v9 }
  0x85   :  { %v45_v10 = vpop.xlane.xlu0 %44 }
  0x86   :  { %v49_v11 = vadd.f32 %v47_v7, %v45_v10 }
  0x88   :  { %52 = vst.msk [vmem:[%s129_s3 + $0x8] sm:$0xff] %vm50_vm1, %v49_v11 }
  0x89   :  { %57 = vsyncpa [#allocation4], 1 }

</bundles_post_ra>
